<compile_context>
chip_gen: v7x
topology: tpu7x:2x2x1
jax: 0.10.0
libtpu: 0.0.40
codegen_flags: <defaults>
</compile_context>

<pallas_src>
import jax
import jax.numpy as jnp
from jax.experimental import pallas as pl
from jax.experimental.pallas import tpu as pltpu


# ----------------------------------------------------------------------------
# Host-side helpers
# ----------------------------------------------------------------------------

_BUF1_PROBED = False
_BUF1 = None


def _buffered_one():
    """pl.Buffered(1): single-buffer weight blocks whose index_map is constant
    (nothing to pipeline, so the default double buffer only wastes VMEM).
    Probed once with a trivial kernel so we degrade gracefully if this Pallas
    build rejects buffer_count=1 (or the pipeline_mode kwarg)."""
    global _BUF1_PROBED, _BUF1
    if _BUF1_PROBED:
        return _BUF1
    _BUF1_PROBED = True
    try:
        def _probe(x_ref, o_ref):
            o_ref[...] = x_ref[...] + 1.0

        fn = pl.pallas_call(
            _probe,
            out_shape=jax.ShapeDtypeStruct((8, 128), jnp.float32),
            grid=(2,),
            in_specs=[pl.BlockSpec((8, 128), lambda i: (0, 0),
                                   pipeline_mode=pl.Buffered(1))],
            out_specs=pl.BlockSpec((8, 128), lambda i: (0, 0)),
        )
        jax.block_until_ready(fn(jnp.zeros((8, 128), jnp.float32)))
        _BUF1 = pl.Buffered(1)
    except Exception:
        _BUF1 = None
    return _BUF1


def _weight_spec(block_shape, index_map, buf_mode):
    if buf_mode is not None:
        return pl.BlockSpec(block_shape, index_map, pipeline_mode=buf_mode)
    return pl.BlockSpec(block_shape, index_map)


def _vmem_limit_bytes():
    """~75% of physical VMEM, capped at 96 MiB.
    v5e/v6e (128 MiB) -> 96 MiB; v7x (64 MiB) -> 48 MiB; fallback -> 48 MiB."""
    default_cap = 64 * 1024 * 1024
    try:
        cap = int(getattr(pltpu.get_tpu_info(), "vmem_capacity_bytes", default_cap))
    except Exception:
        cap = default_cap
    return int(min(96 * 1024 * 1024, (cap * 3) // 4))


def _pick_tn(m, c, f):
    """Batch tile: a multiple-of-8 divisor of m that (a) keeps the block-diag
    contraction K = tn*C inside one native MXU K pass, (b) bounds the
    block-diagonal weight / pooled accumulator VMEM, and (c) leaves >= 2 batch
    tiles so the 'parallel' grid axis can feed both TensorCores (v7x)."""
    divisors8 = [t for t in range(8, m + 1, 8) if m % t == 0]
    good = [t for t in divisors8 if t * c <= 128 and t * f <= 8192]
    two_tiles = [t for t in good if m // t >= 2]
    if two_tiles:
        return max(two_tiles)
    if good:
        return max(good)
    return m  # tiny batches: one full-batch tile (full-dim block, layout-exempt)


def _pick_thw(hw):
    """H*W tile: >= 512 lanes when possible for near-peak DMA bursts."""
    for cand in (2048, 1024, 512, 256, 128):
        if hw % cand == 0:
            return cand
    return hw


def _pick_tm(m2):
    for cand in (256, 128, 64, 32, 16, 8):
        if m2 % cand == 0:
            return cand
    return m2


# ----------------------------------------------------------------------------
# Kernel 1: encoder stand-in + global average pool (the HBM-bound hot loop)
# ----------------------------------------------------------------------------

def _make_encoder_pool_kernel(chunk):
    """x_ref:   (tn*C, thw)   image tile, dense rows = (sample, channel)
       wbd_ref: (tn*F, tn*C)  bf16 block-diag kron(I_tn, w_enc): one
                              weight-stationary 2-D matmul covers all tn samples
       h_ref:   (tn*F, 1)     f32 pooled-sum accumulator, resident over the HW
                              grid axis; rows = (sample, feature)"""
    def kernel(x_ref, wbd_ref, h_ref):
        hw_step = pl.program_id(1)

        @pl.when(hw_step == 0)
        def _():
            h_ref[...] = jnp.zeros_like(h_ref)

        wbd = wbd_ref[...]
        thw = x_ref.shape[1]
        nchunks = thw // chunk  # static python int

        # Chunk the HW (lane) axis so the ReLU'd activation never exceeds
        # (tn*F, chunk): the old (tn, F, thw) f32 intermediate is never built.
        acc = jnp.zeros(h_ref.shape, jnp.float32)
        for j in range(nchunks):  # static trip count (unrolled)
            xc = x_ref[:, j * chunk:(j + 1) * chunk].astype(wbd.dtype)
            feat = jnp.dot(wbd, xc, preferred_element_type=jnp.float32)
            feat = jnp.maximum(feat, 0.0)
            # Lane reduction on the XLU; swap to a ones-column matmul only if a
            # bundle dump shows the XLU (not the idle MXU) is the binding unit.
            acc = acc + jnp.sum(feat, axis=1, keepdims=True)
        h_ref[...] += acc

    return kernel


def _encoder_pool(x2d, w_bd, *, m, c, f, tn, thw, chunk, vmem_limit, buf_mode):
    """x2d: (m*c, HW) in its original dtype. Returns pooled SUMS (m, f) f32."""
    hw = x2d.shape[1]
    assert x2d.shape[0] == m * c
    assert m % tn == 0 and hw % thw == 0 and thw % chunk == 0

    grid = (m // tn, hw // thw)
    grid_spec = pltpu.PrefetchScalarGridSpec(
        num_scalar_prefetch=0,
        grid=grid,
        in_specs=[
            # Dense 2-D x tile: no C<8 sublane padding, no in-kernel relayout.
            pl.BlockSpec((tn * c, thw), lambda n, h: (n, h)),
            # Block-diag encoder weight, resident, single-buffered if possible.
            _weight_spec((tn * f, tn * c), lambda n, h: (0, 0), buf_mode),
        ],
        # Pooled-sum accumulator lives in the (revisited) output block itself.
        out_specs=pl.BlockSpec((tn * f, 1), lambda n, h: (n, 0)),
    )
    h = pl.pallas_call(
        _make_encoder_pool_kernel(chunk),
        out_shape=jax.ShapeDtypeStruct((m * f, 1), jnp.float32),
        grid_spec=grid_spec,
        compiler_params=pltpu.CompilerParams(
            dimension_semantics=("parallel", "arbitrary"),
            vmem_limit_bytes=vmem_limit,
        ),
    )(x2d, w_bd)
    return h.reshape(m, f)  # free: contiguous (m*f, 1) -> (m, f)


# ----------------------------------------------------------------------------
# Kernel 2: projector (Linear -> ReLU -> Linear -> Sigmoid -> Linear, no bias)
# ----------------------------------------------------------------------------

def _make_projector_kernel(inv_hw):
    """h_ref: (tm, F) f32 pooled sums; w*: bf16 (in, out); z_ref: (tm, P_pad)."""
    def kernel(h_ref, w1_ref, w2_ref, w3_ref, z_ref):
        # 1/HW of the average pool applied in f32 BEFORE any bf16 cast.
        hpool = h_ref[...] * jnp.float32(inv_hw)
        a = jnp.maximum(
            jnp.dot(hpool.astype(w1_ref.dtype), w1_ref[...],
                    preferred_element_type=jnp.float32), 0.0)
        b = jax.nn.sigmoid(
            jnp.dot(a.astype(w2_ref.dtype), w2_ref[...],
                    preferred_element_type=jnp.float32))
        z_ref[...] = jnp.dot(b.astype(w3_ref.dtype), w3_ref[...],
                             preferred_element_type=jnp.float32)
    return kernel


def _projector(h, w1, w2, w3p, *, inv_hw, tm, vmem_limit, buf_mode):
    m2, f = h.shape
    p_pad = w3p.shape[1]
    assert m2 % tm == 0
    grid_spec = pltpu.PrefetchScalarGridSpec(
        num_scalar_prefetch=0,
        grid=(m2 // tm,),
        in_specs=[
            pl.BlockSpec((tm, f), lambda i: (i, 0)),
            _weight_spec((f, f), lambda i: (0, 0), buf_mode),
            _weight_spec((f, f), lambda i: (0, 0), buf_mode),
            _weight_spec((f, p_pad), lambda i: (0, 0), buf_mode),
        ],
        out_specs=pl.BlockSpec((tm, p_pad), lambda i: (i, 0)),  # lane-dense z
    )
    return pl.pallas_call(
        _make_projector_kernel(inv_hw),
        out_shape=jax.ShapeDtypeStruct((m2, p_pad), jnp.float32),
        grid_spec=grid_spec,
        compiler_params=pltpu.CompilerParams(
            dimension_semantics=("parallel",),
            vmem_limit_bytes=vmem_limit,
        ),
    )(h, w1, w2, w3p)


# ----------------------------------------------------------------------------
# Module wrapper
# ----------------------------------------------------------------------------

class SimCLRPallas:
    """JAX/Pallas re-implementation of SimCLR.forward for loss_device='cpu'."""

    def __init__(self, in_channels, n_features, projection_dim, key):
        self.in_channels = in_channels
        self.n_features = n_features
        self.projection_dim = projection_dim
        k0, k1, k2, k3 = jax.random.split(key, 4)

        # Encoder stand-in: 1x1-conv weight in PyTorch (out=F, in=C) layout.
        self.w_enc = jax.random.normal(k0, (n_features, in_channels), jnp.float32) * 0.1
        # Projector nn.Linear weights are (out, in) in PyTorch; the kernels
        # compute x @ W, so store the transposed (in, out) form (f32 masters).
        self.w1 = (jax.random.normal(k1, (n_features, n_features), jnp.float32) * 0.1).T
        self.w2 = (jax.random.normal(k2, (n_features, n_features), jnp.float32) * 0.1).T
        self.w3 = (jax.random.normal(k3, (projection_dim, n_features), jnp.float32) * 0.1).T

        # Lane-pad the projection dim to a multiple of 128 for a dense z store.
        self.p_pad = ((projection_dim + 127) // 128) * 128
        self.w3_padded = (jnp.zeros((n_features, self.p_pad), jnp.float32)
                          .at[:, :projection_dim].set(self.w3))

        # bf16 matmul operands (accumulation stays f32 in the kernels).
        self.w1_bf = self.w1.astype(jnp.bfloat16)
        self.w2_bf = self.w2.astype(jnp.bfloat16)
        self.w3p_bf = self.w3_padded.astype(jnp.bfloat16)

        self._wbd_cache = {}

    def _block_diag_enc(self, tn):
        """kron(I_tn, w_enc): one weight-stationary (tn*F, tn*C) 2-D matmul
        covers all tn samples of a batch tile. Cached per tile size."""
        if tn not in self._wbd_cache:
            eye = jnp.eye(tn, dtype=jnp.float32)
            self._wbd_cache[tn] = jnp.kron(eye, self.w_enc).astype(jnp.bfloat16)
        return self._wbd_cache[tn]

    def __call__(self, x, tile_n=None, tile_hw=None, chunk_hw=256):
        # x is a list [x_i, x_j], each NCHW (like the PyTorch module).
        x_i, x_j = x[0], x[1]
        n, c, hgt, wid = x_i.shape
        hw = hgt * wid
        f = self.n_features

        tn = tile_n if tile_n is not None else _pick_tn(n, c, f)
        thw = tile_hw if tile_hw is not None else _pick_thw(hw)
        chunk = min(chunk_hw, thw)
        if thw % chunk:
            chunk = thw
        assert n % tn == 0 and hw % thw == 0

        vmem_limit = _vmem_limit_bytes()
        buf_mode = _buffered_one()
        w_bd = self._block_diag_enc(tn)

        def encode(xv):
            # Free NCHW -> (N*C, H*W) reshape; the original dtype is fed
            # straight to the kernel (no concatenate / cast copy of the input).
            x2d = xv.reshape(n * c, hw)
            return _encoder_pool(x2d, w_bd, m=n, c=c, f=f, tn=tn, thw=thw,
                                 chunk=chunk, vmem_limit=vmem_limit,
                                 buf_mode=buf_mode)

        h_i = encode(x_i)  # (n, F) f32 pooled sums
        h_j = encode(x_j)

        # Projector on the pooled features of both views: tiny (2n, F) input;
        # projector weights are DMA'd once and never resident in the hot loop.
        h = jnp.concatenate([h_i, h_j], axis=0)
        tm = _pick_tm(2 * n)
        z = _projector(h, self.w1_bf, self.w2_bf, self.w3p_bf,
                       inv_hw=1.0 / hw, tm=tm, vmem_limit=vmem_limit,
                       buf_mode=buf_mode)
        z = z[:, : self.projection_dim]
        # loss_device == 'cpu' branch: return the two projections.
        return z[:n], z[n:]


# ----------------------------------------------------------------------------
# Demo / self-check
# ----------------------------------------------------------------------------

if __name__ == "__main__":
    key = jax.random.PRNGKey(0)
    k_model, k_xi, k_xj = jax.random.split(key, 3)

    batch, channels, spatial = 2, 4, 16
    n_features, projection_dim = 32, 16

    model = SimCLRPallas(channels, n_features, projection_dim, k_model)

    x_i = jax.random.normal(k_xi, (batch, channels, spatial, spatial), jnp.float32)
    x_j = jax.random.normal(k_xj, (batch, channels, spatial, spatial), jnp.float32)

    # Two tilings at toy scale (real shapes should use the >=512-lane defaults):
    #   (a) tile_hw=128 -> two HW grid steps (exercises the resident pooled
    #       accumulator / pl.when init path),
    #   (b) tile_hw=256 + chunk_hw=128 -> one grid step, two in-kernel chunks
    #       (exercises the static chunk loop with 128-lane aligned slices).
    z_i, z_j = model([x_i, x_j], tile_hw=128, chunk_hw=128)
    jax.block_until_ready(z_i)
    jax.block_until_ready(z_j)
    z_i2, z_j2 = model([x_i, x_j], tile_hw=256, chunk_hw=128)
    jax.block_until_ready(z_i2)
    jax.block_until_ready(z_j2)

    # Pure-JAX f32 reference of the same forward (encoder stand-in + projector).
    def ref_forward(xv):
        xf = xv.reshape(batch, channels, spatial * spatial)
        feat = jnp.maximum(jnp.einsum("fc,ncw->nfw", model.w_enc, xf), 0.0)
        hpool = feat.mean(axis=-1)
        a = jnp.maximum(hpool @ model.w1, 0.0)
        b = jax.nn.sigmoid(a @ model.w2)
        return b @ model.w3

    r_i = ref_forward(x_i)
    r_j = ref_forward(x_j)

    assert z_i.shape == (batch, projection_dim)
    assert z_j.shape == (batch, projection_dim)
    assert bool(jnp.all(jnp.isfinite(z_i))) and bool(jnp.all(jnp.isfinite(z_j)))
    assert bool(jnp.allclose(z_i, r_i, atol=2e-2, rtol=2e-2))
    assert bool(jnp.allclose(z_j, r_j, atol=2e-2, rtol=2e-2))
    assert bool(jnp.allclose(z_i2, r_i, atol=2e-2, rtol=2e-2))
    assert bool(jnp.allclose(z_j2, r_j, atol=2e-2, rtol=2e-2))
    print("KERNEL_OK")
</pallas_src>

<mosaic_0001>
module attributes {stable_mosaic.version = 11 : i64} {
  func.func @_probe(%arg0: i32, %arg1: memref<8x128xf32, #tpu.memory_space<vmem>>, %arg2: memref<8x128xf32, #tpu.memory_space<vmem>>) attributes {dimension_semantics = [#tpu.dimension_semantics<arbitrary>], iteration_bounds = array<i64: 2>, scalar_prefetch = 0 : i64, scratch_operands = 0 : i64, tpu.core_type = #tpu.core_type<tc>, window_params = [{pipeline_mode = #tpu.pipeline_mode<synchronous>, transform_indices = @transform_0, window_bounds = array<i64: 8, 128>}, {pipeline_mode = #tpu.pipeline_mode<synchronous>, transform_indices = @transform_1, window_bounds = array<i64: 8, 128>}]} {
    %c0 = arith.constant 0 : index
    %c0_0 = arith.constant 0 : index
    %0 = vector.load %arg1[%c0, %c0_0] : memref<8x128xf32, #tpu.memory_space<vmem>>, vector<8x128xf32>
    %cst = arith.constant 1.000000e+00 : f32
    %1 = vector.broadcast %cst : f32 to vector<8x128xf32>
    %2 = arith.addf %0, %1 : vector<8x128xf32>
    %c0_1 = arith.constant 0 : index
    %c0_2 = arith.constant 0 : index
    %3 = vector.load %arg2[%c0_1, %c0_2] : memref<8x128xf32, #tpu.memory_space<vmem>>, vector<8x128xf32>
    tpu.vector_store %arg2[%c0_1, %c0_2], %2 {strides = array<i32>} : memref<8x128xf32, #tpu.memory_space<vmem>>, vector<8x128xf32>,
    return
  }
  func.func @transform_0(%arg0: i32) -> (i32, i32) {
    %c0_i32 = arith.constant 0 : i32
    %c0_i32_0 = arith.constant 0 : i32
    %c0_i32_1 = arith.constant 0 : i32
    return %c0_i32, %c0_i32_0 : i32, i32
  }
  func.func @transform_1(%arg0: i32) -> (i32, i32) {
    %c0_i32 = arith.constant 0 : i32
    %c0_i32_0 = arith.constant 0 : i32
    %c0_i32_1 = arith.constant 0 : i32
    return %c0_i32, %c0_i32_0 : i32, i32
  }
}

module attributes {stable_mosaic.version = 11 : i64} {
  func.func @kernel(%arg0: i32, %arg1: i32, %arg2: memref<8x128xf32, #tpu.memory_space<vmem>>, %arg3: memref<64x8xbf16, #tpu.memory_space<vmem>>, %arg4: memref<64x1xf32, #tpu.memory_space<vmem>>) attributes {dimension_semantics = [#tpu.dimension_semantics<parallel>, #tpu.dimension_semantics<arbitrary>], iteration_bounds = array<i64: 1, 2>, scalar_prefetch = 0 : i64, scratch_operands = 0 : i64, tpu.core_type = #tpu.core_type<tc>, window_params = [{transform_indices = @transform_0, window_bounds = array<i64: 8, 128>}, {pipeline_mode = #tpu.pipeline_mode<synchronous>, transform_indices = @transform_1, window_bounds = array<i64: 64, 8>}, {transform_indices = @transform_2, window_bounds = array<i64: 64, 1>}]} {
    %c0_i32 = arith.constant 0 : i32
    %0 = arith.cmpi eq, %arg1, %c0_i32 : i32
    %1 = arith.extui %0 : i1 to i32
    %c0_i32_0 = arith.constant 0 : i32
    %2 = arith.cmpi ne, %1, %c0_i32_0 : i32
    scf.if %2 {
      %cst_11 = arith.constant 0.000000e+00 : f32
      %16 = vector.broadcast %cst_11 : f32 to vector<64x1xf32>
      %c0_12 = arith.constant 0 : index
      %c0_13 = arith.constant 0 : index
      %17 = vector.load %arg4[%c0_12, %c0_13] : memref<64x1xf32, #tpu.memory_space<vmem>>, vector<64x1xf32>
      tpu.vector_store %arg4[%c0_12, %c0_13], %16 {strides = array<i32>} : memref<64x1xf32, #tpu.memory_space<vmem>>, vector<64x1xf32>,
    } else {
    }
    %c0 = arith.constant 0 : index
    %c0_1 = arith.constant 0 : index
    %3 = vector.load %arg3[%c0, %c0_1] : memref<64x8xbf16, #tpu.memory_space<vmem>>, vector<64x8xbf16>
    %cst = arith.constant 0.000000e+00 : f32
    %4 = vector.broadcast %cst : f32 to vector<64x1xf32>
    %c0_2 = arith.constant 0 : index
    %c0_3 = arith.constant 0 : index
    %5 = vector.load %arg2[%c0_2, %c0_3] : memref<8x128xf32, #tpu.memory_space<vmem>>, vector<8x128xf32>
    %6 = arith.truncf %5 : vector<8x128xf32> to vector<8x128xbf16>
    %cst_4 = arith.constant dense<0.000000e+00> : vector<64x128xf32>
    %7 = tpu.matmul %3, %6, %cst_4 {dimension_numbers = #tpu.dot_dimension_numbers<[1], [0], [0], [1], [0, 0, 1, 1], [], []>} : vector<64x8xbf16>, vector<8x128xbf16>, vector<64x128xf32> -> vector<64x128xf32>
    %cst_5 = arith.constant 0.000000e+00 : f32
    %8 = vector.broadcast %cst_5 : f32 to vector<64x128xf32>
    %9 = arith.maximumf %7, %8 : vector<64x128xf32>
    %cst_6 = arith.constant dense<0.000000e+00> : vector<64xf32>
    %10 = vector.multi_reduction <add>, %9, %cst_6 [1] : vector<64x128xf32> to vector<64xf32>
    %11 = vector.shape_cast %10 : vector<64xf32> to vector<64x1xf32>
    %12 = arith.addf %4, %11 : vector<64x1xf32>
    %c0_7 = arith.constant 0 : index
    %c0_8 = arith.constant 0 : index
    %13 = vector.load %arg4[%c0_7, %c0_8] : memref<64x1xf32, #tpu.memory_space<vmem>>, vector<64x1xf32>
    %14 = arith.addf %13, %12 : vector<64x1xf32>
    %c0_9 = arith.constant 0 : index
    %c0_10 = arith.constant 0 : index
    %15 = vector.load %arg4[%c0_9, %c0_10] : memref<64x1xf32, #tpu.memory_space<vmem>>, vector<64x1xf32>
    tpu.vector_store %arg4[%c0_9, %c0_10], %14 {strides = array<i32>} : memref<64x1xf32, #tpu.memory_space<vmem>>, vector<64x1xf32>,
    return
  }
  func.func @transform_0(%arg0: i32, %arg1: i32) -> (i32, i32) {
    %c0_i32 = arith.constant 0 : i32
    return %arg0, %arg1 : i32, i32
  }
  func.func @transform_1(%arg0: i32, %arg1: i32) -> (i32, i32) {
    %c0_i32 = arith.constant 0 : i32
    %c0_i32_0 = arith.constant 0 : i32
    %c0_i32_1 = arith.constant 0 : i32
    return %c0_i32, %c0_i32_0 : i32, i32
  }
  func.func @transform_2(%arg0: i32, %arg1: i32) -> (i32, i32) {
    %c0_i32 = arith.constant 0 : i32
    %c0_i32_0 = arith.constant 0 : i32
    return %arg0, %c0_i32 : i32, i32
  }
}

</mosaic_0001>

<bundles_post_ra>
// kernel: tpu_custom_call.1
= control target key start
LH: loop header
LB: loop body
LE: loop exit
PB: predicated region body
PF: predicated region fallthrough
CT: control target
= control target key end

     0   :  { %6 = vsyncpa [#allocation3], 0  ;;  %s341_s0 = inlined_call_operand.hbm [shape: f32[8,128], index: 0, kind: input, shape index: {}]   ;;  %s342_s1 = inlined_call_operand.hbm [shape: f32[8,128], index: 1, kind: output, shape index: {}]  }
   0x1   :  { %7 = vsyncpa [#allocation4], 0  ;;  %s262_s6 = smov 0  }
   0x2 LB: > { %s145_s7 = sadd.s32 4294967295, %s248_s6   ;;  %p146_p0 = scmp.ge.s32.totalorder %s248_s6, 1  ;;  %s248_s6 = sphi %s262_s6, %s13_s6  }
   0x3   : > { %p60_p1 = scmp.lt.s32.totalorder %s248_s6, 3  ;;  %p276_p3 = scmp.eq.s32.totalorder %s145_s7, 0 }
   0x4   : > { %s250_s10 = smov [#allocation2]   ;;  %s180_s15 = scalar_lea.hbm %s341_s0, 128 }
   0x5   : > { %p270_p2 = pnand %p146_p0, %p60_p1  ;;  %s73_s11 = sshll.u32 %s250_s10, 4  ;;  %s74_s11 = int_to_ptr.vmem [resolvable:$true] %s73_s11 }
   0x6   : > { %s347_s9 = scalar_select %p276_p3, 1, 0 }
   0x7   : > { %s346_s8 = scalar_select %p270_p2, 1, 0 }
   0x8   : > { %p162_p4 = pneg %p270_p2  ;;  %p181_p6 = scmp.ne.s32.totalorder %s341_s0, %s180_s15 }
   0x9   : > { %p187_p10 = scmp.lt.u32.totalorder %s180_s15, %s341_s0 }
   0xa   : > { %p284_p5 = pnand %p276_p3, %p162_p4 }
   0xc   : > { %p182_p7 = pneg %p284_p5 }
   0xe   : > { %p183_p8 = pnand %p182_p7, %p181_p6 }
  0x10   : > { %p184_p9 = pneg %p183_p8 }
  0x12   : > { %p189_p11 = pnand %p187_p10, %p184_p9 }
  0x14   : > { %192 = shalt.err (!%p189_p11)
}
  0x15   : > { %s193_s20 = scalar_lea.vmem %s74_s11, 128  ;;  %p201_p1 = scmp.lt.s32.totalorder %s74_s11, %s74_s11 }
  0x16   : > { %p194_p12 = scmp.ne.s32.totalorder %s74_s11, %s193_s20  ;;  %p202_p4 = scmp.lt.s32.totalorder %s193_s20, %s193_s20 }
  0x18   : > { %p196_p13 = pnand %p194_p12, %p182_p7  ;;  %p203_p3 = por %p202_p4, %p201_p1 }
  0x1a   : > { %p197_p0 = pneg %p196_p13 }
  0x1c   : > { %p204_p2 = pnand %p203_p3, %p197_p0 }
  0x1e   : > { %207 = shalt.err (!%p204_p2)
}
  0x1f   : > { %165 = dma.hbm_to_vmem [thread:$0]  (!%p284_p5), %s341_s0, 128, %s74_s11, [#allocation3]  }
  0x20   : > { %p349_p6 = scmp.ne.s32.totalorder %s346_s8, 0 }
  0x21   : > { %p350_p8 = scmp.ne.s32.totalorder (!%p349_p6), %s347_s9, 0 }
  0x22   : > { %86 = sbr.rel (%p349_p6) target bundleno = 67 (0x43), region = 24 }
  0x29   : > { %239 = dma.done.wait (%p350_p8), [#allocation3], 128  }
  0x2a   : > { %241 = vsyncadd (%p350_p8), [#allocation3], 4294967168  ;;  %s251_s23 = smov [#allocation5]   ;;  %v96_v0 = vld [vmem:[#allocation2] sm:$0xff]  ;;  %p312_p2 = scmp.eq.s32.totalorder %s145_s7, 1 }
  0x2b   : > { %s106_s24 = sshll.u32 %s251_s23, 4  ;;  %v97_v1 = vadd.f32 1.0, %v96_v0  ;;  %s107_s24 = int_to_ptr.vmem [resolvable:$true] %s106_s24 }
  0x2c   : > { %s208_s26 = scalar_lea.vmem %s107_s24, 128  ;;  %p215_p9 = scmp.lt.s32.totalorder %s107_s24, %s107_s24 }
  0x2d   : > { %98 = vst [vmem:[#allocation5] sm:$0xff] %v97_v1  ;;  %p209_p3 = scmp.ne.s32.totalorder %s107_s24, %s208_s26  ;;  %p216_p10 = scmp.lt.s32.totalorder %s208_s26, %s208_s26 }
  0x2f   : > { %p210_p5 = pnand %p209_p3, %p312_p2  ;;  %p217_p11 = por %p216_p10, %p215_p9 }
  0x31   : > { %p211_p7 = pneg %p210_p5 }
  0x33   : > { %p218_p12 = pnand %p217_p11, %p211_p7 }
  0x35   : > { %221 = shalt.err (!%p218_p12)
}
  0x36   : > { %s222_s29 = scalar_lea.hbm %s342_s1, 128 }
  0x37   : > { %p223_p13 = scmp.ne.s32.totalorder %s342_s1, %s222_s29  ;;  %p228_p4 = scmp.lt.u32.totalorder %s222_s29, %s342_s1 }
  0x39   : > { %p224_p0 = pnand %p223_p13, %p312_p2 }
  0x3b   : > { %p225_p1 = pneg %p224_p0 }
  0x3d   : > { %p230_p6 = pnand %p228_p4, %p225_p1 }
  0x3f   : > { %233 = shalt.err (!%p230_p6)
}
  0x40   : > { %159 = dma.vmem_to_hbm [thread:$0]  (%p312_p2), %s107_s24, 128, %s342_s1, [#allocation4]  }
  0x41   : > { %243 = dma.done.wait (%p312_p2), [#allocation4], 128  }
  0x42   : > { %245 = vsyncadd (%p312_p2), [#allocation4], 4294967168 }
  0x43 PF: > { %s13_s6 = sadd.s32 1, %s248_s6  }
  0x44   : > { %p10_p8 = scmp.ge.s32.totalorder %s13_s6, 4  }
  0x46   :  { %12 = sbr.rel (!%p10_p8) target bundleno = 2 (0x2), region = 53 }
  0x4d   :  { %119 = vsyncpa [#allocation3], 1 }
  0x4e   :  { %121 = vsyncpa [#allocation3 + $0x1], 1 }
  0x4f   :  { %122 = vsyncpa [#allocation4], 1 }
  0x50   :  { %124 = vsyncpa [#allocation4 + $0x1], 1 }

// kernel: tpu_custom_call.1
= control target key start
LH: loop header
LB: loop body
LE: loop exit
PB: predicated region body
PF: predicated region fallthrough
CT: control target
= control target key end

     0   :  { %s525_s9 = smov 0   ;;  %s527_s10 = smov 0   ;;  %s647_s0 = inlined_call_operand.vmem [shape: f32[8,256], index: 0, kind: input, shape index: {}]   ;;  %s648_s1 = inlined_call_operand.vmem [shape: bf16[64,8], index: 1, kind: input, shape index: {}]   ;;  %s649_s2 = inlined_call_operand.vmem [shape: f32[64,1], index: 2, kind: output, shape index: {}]  }
   0x1   :  { %s529_s11 = smov 0  }
   0x2 LB: > { %s21_s12 = sadd.s32 1, %s503_s10  ;;  %p422_p0 = scmp.ge.s32.totalorder %s507_s11, 1  ;;  %s507_s11 = sphi %s529_s11, %s12_s11   ;;  %s503_s10 = sphi %s527_s10, %s651_s10   ;;  %s499_s9 = sphi %s525_s9, %s650_s9  }
   0x3   : > { %p22_p1 = scmp.ge.s32.totalorder %s21_s12, 2  ;;  %p129_p2 = scmp.lt.s32.totalorder %s507_s11, 3 }
   0x5   : > { %s653_s12 = smov (%p22_p1, %s21_s12), 0  ;;  %p130_p3 = pnand %p422_p0, %p129_p2 }
   0x6   : > { %p156_p4 = scmp.lt.s32.totalorder (!%p130_p3), %s499_s9, 1  ;;  %p424_p5 = scmp.ne.s32.totalorder (!%p130_p3), %s499_s9, 0 }
   0x7   : > { %133 = sbr.rel (%p130_p3) target bundleno = 401 (0x191), region = 28 }
   0xe   : > { %s157_s13 = scalar_select %p156_p4, %s499_s9, 1 }
   0xf   : > { %172 = sbr.rel (%p424_p5) target bundleno = 22 (0x16), region = 32  ;;  %vm173_vm0 = vcmask (!%p424_p5), 7168   ;;  %v509_v0 = vmov (!%p424_p5), 0.0  }
  0x10   : > { %s423_s14 = sshll.u32 %s157_s13, 3  ;;  %174 = vst.msk [vmem:[%s649_s2] sm:$0xff] (!%p424_p5), %vm173_vm0, %v509_v0  ;;  %175 = vst.msk [vmem:[%s649_s2 + $0x8] sm:$0xff] (!%p424_p5), %vm173_vm0, %v509_v0 }
  0x11   : > { %s161_s17 = scalar_lea.vmem %s647_s0, %s423_s14  ;;  %176 = vst.msk [vmem:[%s649_s2 + $0x10] sm:$0xff] (!%p424_p5), %vm173_vm0, %v509_v0  ;;  %177 = vst.msk [vmem:[%s649_s2 + $0x18] sm:$0xff] (!%p424_p5), %vm173_vm0, %v509_v0 }
  0x12   : > { %178 = vst.msk [vmem:[%s649_s2 + $0x20] sm:$0xff] (!%p424_p5), %vm173_vm0, %v509_v0  ;;  %179 = vst.msk [vmem:[%s649_s2 + $0x28] sm:$0xff] (!%p424_p5), %vm173_vm0, %v509_v0 }
  0x13   : > { %180 = vst.msk [vmem:[%s649_s2 + $0x30] sm:$0xff] (!%p424_p5), %vm173_vm0, %v509_v0  ;;  %181 = vst.msk [vmem:[%s649_s2 + $0x38] sm:$0xff] (!%p424_p5), %vm173_vm0, %v509_v0 }
  0x16 PF: > { %v190_v1 = vld [vmem:[%s161_s17] sm:$0xff]  ;;  %vm225_vm1 = vcmask 1043456   ;;  %vm212_vm2 = vcmask 64512   ;;  %v482_v4 = vld [vmem:[%s648_s1 + $0x8] sm:$0xff]   ;;  %v483_v6 = vld [vmem:[%s648_s1 + $0x10] sm:$0xff]   ;;  %vm342_vm3 = vcmask 7168  }
  0x17   : > { %v191_v2 = vpack.c.bf16 %v190_v1, %v190_v1  ;;  %v481_v3 = vld [vmem:[%s648_s1] sm:$0xff]   ;;  %v484_v7 = vld [vmem:[%s648_s1 + $0x18] sm:$0xff]   ;;  %448 = vmatprep.mubr.msk.bf16.mxu1 %vm212_vm2, %v483_v6  ;;  %v327_v37 = vld [vmem:[%s649_s2 + $0x8] sm:$0xff] }
  0x18   : > { %444 = vmatprep.mubr.msk.bf16.mxu0 %vm212_vm2, %v481_v3  ;;  %v328_v24 = vld [vmem:[%s649_s2 + $0x10] sm:$0xff]  ;;  %v326_v25 = vld [vmem:[%s649_s2] sm:$0xff]  ;;  %v329_v30 = vld [vmem:[%s649_s2 + $0x18] sm:$0xff] }
  0x19   : > { %454 = vmatprep.subr.msk.bf16.mxu0 %vm225_vm1, %v191_v2  ;;  %455 = vmatprep.subr.msk.bf16.mxu1 %vm225_vm1, %v191_v2  ;;  %v227_v5 = vsel %vm225_vm1, %v191_v2, 0  ;;  %v330_v31 = vld [vmem:[%s649_s2 + $0x20] sm:$0xff]  ;;  %v331_v36 = vld [vmem:[%s649_s2 + $0x28] sm:$0xff] }
  0x1a   : > { %443 = vmatpush3.bf16.msra.mxu0 %v227_v5  ;;  %453 = vmatpush3.bf16.msra.mxu1 %v227_v5  ;;  %v333_v42 = vld [vmem:[%s649_s2 + $0x38] sm:$0xff]  ;;  %v332_v43 = vld [vmem:[%s649_s2 + $0x30] sm:$0xff] }
  0x1d   : > { %445 = vmatmul.mubr.msk.bf16.vlgmr.msra.gmra.mrb[0].mxu0 %vm212_vm2, %v482_v4  ;;  %449 = vmatmul.mubr.msk.bf16.vlgmr.msra.gmra.mrb[0].mxu1 %vm212_vm2, %v484_v7 }
  0xf0   : > { %v446_v8 = vpop.f32.mrb[0].mxu0  ;;  %v450_v9 = vpop.f32.mrb[0].mxu1 }
  0xf1   : > { %v263_v10 = vpop.f32.mrb[1].mxu0  ;;  %v279_v11 = vpop.f32.mrb[1].mxu1  ;;  %v296_v12 = vmax.f32 %v446_v8, 0.0  ;;  %v300_v23 = vmax.f32 %v450_v9, 0.0 }
  0xf2   : > { %v447_v13 = vpop.f32.mrb[2].mxu0  ;;  %v451_v14 = vpop.f32.mrb[2].mxu1  ;;  %v294_v15 = vmax.f32 %v263_v10, 0.0  ;;  %v298_v18 = vmax.f32 %v279_v11, 0.0 }
  0xf3   : > { %306 = vadd.xlane.f32.xlu1 %v296_v12  ;;  %v266_v16 = vpop.f32.mrb[3].mxu0  ;;  %v282_v17 = vpop.f32.mrb[3].mxu1  ;;  %v297_v19 = vmax.f32 %v447_v13, 0.0  ;;  %v301_v22 = vmax.f32 %v451_v14, 0.0 }
  0xf4   : > { %302 = vadd.xlane.f32.xlu0 %v294_v15  ;;  %v299_v20 = vmax.f32 %v282_v17, 0.0  ;;  %v295_v21 = vmax.f32 %v266_v16, 0.0 }
  0xf7   : > { %308 = vadd.xlane.f32.xlu1 %v297_v19 }
  0xf8   : > { %310 = vadd.xlane.f32.xlu0 %v298_v18 }
  0xfb   : > { %312 = vadd.xlane.f32.xlu1 %v299_v20 }
  0xfc   : > { %304 = vadd.xlane.f32.xlu0 %v295_v21 }
  0xff   : > { %316 = vadd.xlane.f32.xlu1 %v301_v22 }
 0x100   : > { %314 = vadd.xlane.f32.xlu0 %v300_v23 }
 0x180   : > { %v307_v26 = vpop.xlane.xlu1 %306 }
 0x181   : > { %v336_v27 = vadd.f32 %v328_v24, %v307_v26  ;;  %v303_v28 = vpop.xlane.xlu0 %302 }
 0x182   : > { %v334_v29 = vadd.f32 %v326_v25, %v303_v28 }
 0x183   : > { %345 = vst.msk [vmem:[%s649_s2 + $0x10] sm:$0xff] %vm342_vm3, %v336_v27 }
 0x184   : > { %343 = vst.msk [vmem:[%s649_s2] sm:$0xff] %vm342_vm3, %v334_v29  ;;  %v309_v32 = vpop.xlane.xlu1 %308 }
 0x185   : > { %v337_v33 = vadd.f32 %v329_v30, %v309_v32  ;;  %v311_v34 = vpop.xlane.xlu0 %310 }
 0x186   : > { %v338_v35 = vadd.f32 %v330_v31, %v311_v34 }
 0x187   : > { %346 = vst.msk [vmem:[%s649_s2 + $0x18] sm:$0xff] %vm342_vm3, %v337_v33 }
 0x188   : > { %347 = vst.msk [vmem:[%s649_s2 + $0x20] sm:$0xff] %vm342_vm3, %v338_v35  ;;  %v313_v38 = vpop.xlane.xlu1 %312 }
 0x189   : > { %v339_v39 = vadd.f32 %v331_v36, %v313_v38  ;;  %v305_v40 = vpop.xlane.xlu0 %304 }
 0x18a   : > { %v335_v41 = vadd.f32 %v327_v37, %v305_v40 }
 0x18b   : > { %348 = vst.msk [vmem:[%s649_s2 + $0x28] sm:$0xff] %vm342_vm3, %v339_v39 }
 0x18c   : > { %344 = vst.msk [vmem:[%s649_s2 + $0x8] sm:$0xff] %vm342_vm3, %v335_v41  ;;  %v317_v44 = vpop.xlane.xlu1 %316 }
 0x18d   : > { %v341_v45 = vadd.f32 %v333_v42, %v317_v44  ;;  %v315_v46 = vpop.xlane.xlu0 %314 }
 0x18e   : > { %v340_v47 = vadd.f32 %v332_v43, %v315_v46 }
 0x18f   : > { %350 = vst.msk [vmem:[%s649_s2 + $0x38] sm:$0xff] %vm342_vm3, %v341_v45 }
 0x190   : > { %349 = vst.msk [vmem:[%s649_s2 + $0x30] sm:$0xff] %vm342_vm3, %v340_v47 }
 0x191 PF: > { %s12_s11 = sadd.s32 1, %s507_s11   ;;  %s650_s9 = smov %s503_s10 }
 0x192   : > { %p9_p6 = scmp.ge.s32.totalorder %s12_s11, 4   ;;  %s651_s10 = smov %s653_s12 }
 0x194   :  { %11 = sbr.rel (!%p9_p6) target bundleno = 2 (0x2), region = 62 }

</bundles_post_ra>
